<compile_context>
chip_gen: v7x
topology: tpu7x:2x2x1
jax: 0.10.0
libtpu: 0.0.40
codegen_flags: <defaults>
</compile_context>

<pallas_src>
import jax
import jax.numpy as jnp
from jax.experimental import pallas as pl
from jax.experimental.pallas import tpu as pltpu

# The original module reads `self.max_len` / `self.device` from its config
# decorator; we fix a deterministic synthetic max_len here (multiple of 128
# for lane-dense stores).
MAX_LEN = 128

# Below this batch size the whole mask is tiny; pallas_call launch + pipeline
# prologue exceed the work by orders of magnitude, so let XLA fuse it.
_SMALL_BATCH_THRESHOLD = 256


def _round_up(x: int, m: int) -> int:
    return ((x + m - 1) // m) * m


def _choose_batch_tile(b_pad32: int) -> int:
    """Largest multiple-of-32 tile that divides the (32-aligned) padded batch,
    capped at 512, while keeping >= 2 grid steps when the batch allows it
    (so both v7x TensorCores get work under "parallel" semantics)."""
    if b_pad32 <= 32:
        return 32
    best = 32
    limit = min(512, b_pad32 // 2)  # grid >= 2 when possible
    tb = 32
    while tb <= limit:
        if b_pad32 % tb == 0:
            best = tb
        tb += 32
    return best


def _choose_lane_tile(max_len: int) -> int:
    """Full width for small max_len; otherwise the largest multiple-of-128
    divisor <= 2048 so output stores stay unmasked and lane-dense while each
    block (and its double buffer) stays small in VMEM."""
    if max_len <= 2048 or max_len % 128 != 0:
        return max_len
    for tl in (2048, 1024, 512, 256, 128):
        if max_len % tl == 0:
            return tl
    return max_len


def _masking_kernel(seq_ref, out_ref):
    # seq_ref: (TB, 1) int32 block of sequence lengths.
    # out_ref: (TB, TL) uint8 output block; lane offset comes from grid axis 1.
    tl = out_ref.shape[1]
    lane_off = pl.program_id(1) * tl
    seq = seq_ref[...]                                                # (TB, 1)
    col = jax.lax.broadcasted_iota(jnp.int32, out_ref.shape, 1) + lane_off
    out_ref[...] = (col < seq).astype(jnp.uint8)


def masking(sequence_length: jax.Array, max_len: int = MAX_LEN,
            *, force_pallas: bool = False) -> jax.Array:
    """Pallas equivalent of Masking.forward.

    Args:
      sequence_length: int array of shape [B].
      max_len: mask length (lane dimension).
      force_pallas: run the Pallas kernel even for tiny batches (testing).

    Returns:
      uint8 array of shape [B, max_len].
    """
    b = sequence_length.shape[0]
    if b < _SMALL_BATCH_THRESHOLD and not force_pallas:
        # Tiny problem: a single fused iota+compare beats any kernel launch.
        return masking_ref(sequence_length, max_len)

    b_pad = _round_up(b, 32)
    tb = _choose_batch_tile(b_pad)
    tl = _choose_lane_tile(max_len)

    seq2d = sequence_length.astype(jnp.int32).reshape(b, 1)
    if b_pad != b:
        # Padded rows get seq=0 -> all-zero mask rows, sliced off below.
        seq2d = jnp.pad(seq2d, ((0, b_pad - b), (0, 0)))

    grid = (b_pad // tb, max_len // tl)

    out = pl.pallas_call(
        _masking_kernel,
        out_shape=jax.ShapeDtypeStruct((b_pad, max_len), jnp.uint8),
        grid_spec=pltpu.PrefetchScalarGridSpec(
            num_scalar_prefetch=0,
            grid=grid,
            in_specs=[pl.BlockSpec((tb, 1), lambda i, j: (i, 0))],
            out_specs=pl.BlockSpec((tb, tl), lambda i, j: (i, j)),
        ),
        compiler_params=pltpu.CompilerParams(
            dimension_semantics=("parallel", "parallel")),
    )(seq2d)

    if b_pad != b:
        out = out[:b]
    return out


def masking_ref(sequence_length: jax.Array, max_len: int = MAX_LEN) -> jax.Array:
    """Pure-JAX reference mirroring the PyTorch loop semantics."""
    col = jnp.arange(max_len, dtype=jnp.int32)[None, :]
    return (col < sequence_length.astype(jnp.int32)[:, None]).astype(jnp.uint8)


if __name__ == "__main__":
    key = jax.random.PRNGKey(0)
    k1, k2 = jax.random.split(key)

    # Small deterministic batch: force the Pallas path so the kernel itself
    # is exercised (default dispatch would take the fused-XLA fast path).
    batch = 8
    seq_len = jax.random.randint(k1, (batch,), minval=0, maxval=MAX_LEN + 1,
                                 dtype=jnp.int32)
    out = jax.block_until_ready(masking(seq_len, force_pallas=True))
    ref = masking_ref(seq_len)
    assert out.shape == (batch, MAX_LEN)
    assert out.dtype == jnp.uint8
    assert jnp.array_equal(out, ref), "Pallas output mismatch vs reference (B=8)"

    # Larger batch: default dispatch hits the Pallas path, exercises the
    # 32-aligned multi-step grid, padding, and the post-kernel slice.
    batch_big = 300  # -> padded to 320, tile 160, grid (2, 1)
    seq_len_big = jax.random.randint(k2, (batch_big,), minval=0,
                                     maxval=MAX_LEN + 1, dtype=jnp.int32)
    out_big = jax.block_until_ready(masking(seq_len_big))
    ref_big = masking_ref(seq_len_big)
    assert out_big.shape == (batch_big, MAX_LEN)
    assert out_big.dtype == jnp.uint8
    assert jnp.array_equal(out_big, ref_big), "Pallas output mismatch (B=300)"

    # Edge cases through the Pallas path: zero-length and full-length rows.
    seq_edge = jnp.array([0, MAX_LEN, 1, MAX_LEN - 1, 5, 64, 127, 2],
                         dtype=jnp.int32)
    out_edge = jax.block_until_ready(masking(seq_edge, force_pallas=True))
    assert jnp.array_equal(out_edge, masking_ref(seq_edge)), "edge-case mismatch"

    # Tiny-batch dispatch (pure-JAX fast path) stays consistent too.
    out_small = jax.block_until_ready(masking(seq_len))
    assert jnp.array_equal(out_small, ref)

    print("KERNEL_OK")
</pallas_src>

<mosaic_0001>
module attributes {stable_mosaic.version = 11 : i64} {
  func.func @_masking_kernel(%arg0: i32, %arg1: i32, %arg2: memref<32x1xi32, #tpu.memory_space<vmem>>, %arg3: memref<32x128xi8, #tpu.memory_space<vmem>>) attributes {dimension_semantics = [#tpu.dimension_semantics<parallel>, #tpu.dimension_semantics<parallel>], iteration_bounds = array<i64: 1, 1>, scalar_prefetch = 0 : i64, scratch_operands = 0 : i64, tpu.core_type = #tpu.core_type<tc>, window_params = [{transform_indices = @transform_0, window_bounds = array<i64: 32, 1>}, {transform_indices = @transform_1, window_bounds = array<i64: 32, 128>}]} {
    %c128_i32 = arith.constant 128 : i32
    %0 = arith.muli %arg1, %c128_i32 : i32
    %c0 = arith.constant 0 : index
    %c0_0 = arith.constant 0 : index
    %1 = vector.load %arg2[%c0, %c0_0] : memref<32x1xi32, #tpu.memory_space<vmem>>, vector<32x1xi32>
    %2 = tpu.iota {dimensions = array<i32: 1>} : vector<32x128xi32>
    %3 = vector.broadcast %0 : i32 to vector<32x128xi32>
    %4 = arith.addi %2, %3 : vector<32x128xi32>
    %5 = vector.broadcast %1 : vector<32x1xi32> to vector<32x128xi32>
    %6 = arith.cmpi slt, %4, %5 : vector<32x128xi32>
    %7 = arith.extui %6 : vector<32x128xi1> to vector<32x128xi8>
    %c0_1 = arith.constant 0 : index
    %c0_2 = arith.constant 0 : index
    %8 = vector.load %arg3[%c0_1, %c0_2] : memref<32x128xi8, #tpu.memory_space<vmem>>, vector<32x128xi8>
    tpu.vector_store %arg3[%c0_1, %c0_2], %7 {strides = array<i32>} : memref<32x128xi8, #tpu.memory_space<vmem>>, vector<32x128xi8>,
    return
  }
  func.func @transform_0(%arg0: i32, %arg1: i32) -> (i32, i32) {
    %c0_i32 = arith.constant 0 : i32
    %c0_i32_0 = arith.constant 0 : i32
    return %arg0, %c0_i32 : i32, i32
  }
  func.func @transform_1(%arg0: i32, %arg1: i32) -> (i32, i32) {
    %c0_i32 = arith.constant 0 : i32
    return %arg0, %arg1 : i32, i32
  }
}

</mosaic_0001>

<bundles_post_ra>
// kernel: tpu_custom_call.1
= control target key start
LH: loop header
LB: loop body
LE: loop exit
PB: predicated region body
PF: predicated region fallthrough
CT: control target
= control target key end

     0   :  { %v83_v2 = vmov 0   ;;  %s119_s0 = inlined_call_operand.vmem [shape: s32[32,1], index: 0, kind: input, shape index: {}]   ;;  %s120_s1 = inlined_call_operand.hbm [shape: u8[32,128], index: 1, kind: output, shape index: {}]  }
   0x1   :  { %v14_v0 = vld [vmem:[%s119_s0 + $0x10] sm:$0xff]  ;;  %v12_v1 = vld [vmem:[%s119_s0] sm:$0xff]  ;;  %58 = vset.pattern.permute.xlu1 %v83_v2  ;;  %57 = vset.pattern.permute.xlu0 %v83_v2 }
   0x2   :  { %6 = vsyncpa [#allocation3], 0  ;;  %27 = vperm.xlu1 %58, %v14_v0   ;;  %21 = vperm.xlu0 %57, %v12_v1   ;;  %v15_v3 = vld [vmem:[%s119_s0 + $0x18] sm:$0xff]  ;;  %v13_v4 = vld [vmem:[%s119_s0 + $0x8] sm:$0xff]  ;;  %v16_v5 = vlaneseq  ;;  %s84_s14 = smov [#allocation2]  }
   0x3   :  { %s47_s15 = sshll.u32 %s84_s14, 4  ;;  %s48_s15 = int_to_ptr.vmem [resolvable:$true] %s47_s15 }
   0x4   :  { %v17_v8 = vand.u32 127, %v16_v5  ;;  %s59_s0 = scalar_lea.vmem %s48_s15, 128  ;;  %p64_p1 = scmp.lt.s32.totalorder %s48_s15, %s48_s15 }
   0x5   :  { %p60_p0 = scmp.ne.s32.totalorder %s48_s15, %s59_s0  ;;  %p65_p2 = scmp.lt.s32.totalorder %s59_s0, %s59_s0 }
   0x6   :  { %30 = vperm.xlu1 %58, %v15_v3   ;;  %24 = vperm.xlu0 %57, %v13_v4  }
   0x7   :  { %p66_p3 = por %p65_p2, %p64_p1 }
   0x9   :  { %p67_p4 = pnand %p66_p3, %p60_p0 }
  0x81   :  { %v28_v6 = vpop.permute.xlu1 %27  ;;  %v22_v7 = vpop.permute.xlu0 %21 }
  0x82   :  { %vm34_vm0 = vcmp.lt.s32.totalorder %v17_v8, %v28_v6  ;;  %vm32_vm3 = vcmp.lt.s32.totalorder %v17_v8, %v22_v7 }
  0x85   :  { %v31_v9 = vpop.permute.xlu1 %30  ;;  %v25_v10 = vpop.permute.xlu0 %24 }
  0x86   :  { %vm35_vm1 = vcmp.lt.s32.totalorder %v17_v8, %v31_v9  ;;  %vm33_vm2 = vcmp.lt.s32.totalorder %v17_v8, %v25_v10 }
  0x87   :  { %vm37_vm4 = vmpackc.low %vm35_vm1, %vm34_vm0 }
  0x88   :  { %vm36_vm5 = vmpackc.low %vm33_vm2, %vm32_vm3 }
  0x89   :  { %vm38_vm6 = vmpackc.even %vm37_vm4, %vm36_vm5 }
  0x8a   :  { %v39_v11 = vsel %vm38_vm6, 16843009, %v83_v2 }
  0x8b   :  { %40 = vst [vmem:[#allocation2] sm:$0xff] %v39_v11 }
  0x8c   :  { %70 = shalt.err (!%p67_p4)
}
  0x8d   :  { %s71_s18 = scalar_lea.hbm %s120_s1, 128 }
  0x8e   :  { %p72_p5 = scmp.ne.s32.totalorder %s120_s1, %s71_s18  ;;  %p75_p6 = scmp.lt.u32.totalorder %s71_s18, %s120_s1 }
  0x90   :  { %p77_p7 = pnand %p75_p6, %p72_p5 }
  0x92   :  { %80 = shalt.err (!%p77_p7)
}
  0x93   :  { %50 = dma.vmem_to_hbm [thread:$0]  %s48_s15, 128, %s120_s1, [#allocation3]  }
  0x94   :  { %81 = dma.done.wait [#allocation3], 128  }
  0x95   :  { %82 = vsyncadd [#allocation3], 4294967168 }
  0x96   :  { %54 = vsyncpa [#allocation3], 1 }

</bundles_post_ra>
